<compile_context>
chip_gen: v6e
topology: v6e:2x2x1
jax: 0.10.0
libtpu: 0.0.40
codegen_flags: <defaults>
</compile_context>

<pallas_src>
import jax
import jax.numpy as jnp
from jax.experimental import pallas as pl
from jax.experimental.pallas import tpu as pltpu

EPS = 1e-5


def _make_kernel(N, C1, KC, O2, L0):
    L2 = L0 - KC + 1
    inv_count = 1.0 / float(N * L2)
    nparam = O2 * C1 * KC  # offset of gamma inside the packed param vector

    def kernel(x_ref, p_ref, o_ref):
        # x: (N, C1, L0) in VMEM.  p: flat f32[nparam + 2*O2] in SMEM
        # (row-major w_comb | gamma | beta), read as scalars.
        x = x_ref[...]

        # ---- hoist the C1*KC distinct input slices once ------------------------
        xs = [[x[:, c, k:k + L2] for k in range(KC)] for c in range(C1)]

        # ---- composed conv: one unrolled scalar-FMA pass per output channel ----
        accs = []
        for o in range(O2):
            acc = None
            for c in range(C1):
                for k in range(KC):
                    w = p_ref[(o * C1 + c) * KC + k]          # scalar from SMEM
                    term = w * xs[c][k]
                    acc = term if acc is None else acc + term
            accs.append(acc)                                   # (N, L2) f32

        # ---- fused BN statistics: one lane-reduction tree for all channels -----
        # slab rows: [acc_0 .. acc_{O2-1}, acc_0^2 .. acc_{O2-1}^2]
        slab = jnp.concatenate(accs + [a * a for a in accs], axis=0)   # (2*O2*N, L2)
        col = jnp.sum(slab, axis=1, keepdims=True)                     # (2*O2*N, 1)

        # ---- per-channel affine (training-mode BN) + direct store --------------
        for o in range(O2):
            s = jnp.sum(col[o * N:(o + 1) * N, :])
            ss = jnp.sum(col[(O2 + o) * N:(O2 + o + 1) * N, :])
            mean = s * inv_count
            var = ss * inv_count - mean * mean                 # biased, as in PyTorch
            gamma = p_ref[nparam + o]
            beta = p_ref[nparam + O2 + o]
            a = gamma * jax.lax.rsqrt(var + EPS)               # per-channel scale
            b = beta - mean * a                                # per-channel shift
            o_ref[:, o, :] = (accs[o] * a + b).astype(o_ref.dtype)

    return kernel


def model_forward(x, w1, b1, w2, b2, gamma, beta):
    N, C1, L0 = x.shape
    O1, _, K1 = w1.shape
    O2, _, K2 = w2.shape
    KC = K1 + K2 - 1
    L2 = L0 - KC + 1

    # Both conv biases are mathematically no-ops under training-mode BatchNorm:
    # a per-channel constant (b2, and b1 pushed through the linear conv2) is
    # exactly cancelled by the batch-mean subtraction.
    del b1, b2

    # Fold conv1 ∘ conv2 (both cross-correlations, VALID, stride 1) into one
    # composed cross-correlation:  w_comb[o,i,k] = Σ_c Σ_{k1+k2=k} w2[o,c,k2]·w1[c,i,k1]
    w1f = w1.astype(jnp.float32)
    w2f = w2.astype(jnp.float32)
    w_comb = jnp.zeros((O2, C1, KC), jnp.float32)
    for k1 in range(K1):
        for k2 in range(K2):
            w_comb = w_comb.at[:, :, k1 + k2].add(
                jnp.einsum("oc,ci->oi", w2f[:, :, k2], w1f[:, :, k1])
            )

    # One flat SMEM parameter vector: w_comb (row-major) | gamma | beta.
    params = jnp.concatenate(
        [w_comb.reshape(-1),
         gamma.reshape(-1).astype(jnp.float32),
         beta.reshape(-1).astype(jnp.float32)]
    )

    kernel = _make_kernel(N, C1, KC, O2, L0)
    smem = pl.BlockSpec(memory_space=pltpu.MemorySpace.SMEM)
    vmem = pl.BlockSpec(memory_space=pltpu.MemorySpace.VMEM)

    return pl.pallas_call(
        kernel,
        out_shape=jax.ShapeDtypeStruct((N, O2, L2), jnp.float32),
        in_specs=[vmem, smem],
        out_specs=vmem,
    )(x.astype(jnp.float32), params)


def _reference(x, w1, b1, w2, b2, gamma, beta):
    # Independent pure-JAX reference (same 2-channel BN interpretation).
    dn = ("NCH", "OIH", "NCH")
    y1 = jax.lax.conv_general_dilated(x, w1, (1,), "VALID", dimension_numbers=dn)
    y1 = y1 + b1[None, :, None]
    y2 = jax.lax.conv_general_dilated(y1, w2, (1,), "VALID", dimension_numbers=dn)
    y2 = y2 + b2[None, :, None]
    mean = jnp.mean(y2, axis=(0, 2), keepdims=True)
    var = jnp.mean((y2 - mean) ** 2, axis=(0, 2), keepdims=True)
    return (y2 - mean) * jax.lax.rsqrt(var + EPS) * gamma[None, :, None] + beta[None, :, None]


def _uniform(key, shape, bound):
    return jax.random.uniform(key, shape, jnp.float32, minval=-bound, maxval=bound)


if __name__ == "__main__":
    key = jax.random.PRNGKey(0)
    kx, k1, k2, k3, k4 = jax.random.split(key, 5)

    # Small shapes consistent with the module: channels fixed by the module,
    # batch / length chosen small.
    N, C_IN, L = 2, 2, 16
    O1, O2, K = 3, 2, 2

    x = jax.random.normal(kx, (N, C_IN, L), jnp.float32)

    # Deterministic parameter init (PyTorch-style uniform(-1/sqrt(fan_in), 1/sqrt(fan_in))).
    bound1 = 1.0 / (C_IN * K) ** 0.5
    w1 = _uniform(k1, (O1, C_IN, K), bound1)
    b1 = _uniform(k2, (O1,), bound1)

    bound2 = 1.0 / (O1 * K) ** 0.5
    w2 = _uniform(k3, (O2, O1, K), bound2)
    b2 = _uniform(k4, (O2,), bound2)

    gamma = jnp.ones((O2,), jnp.float32)   # BatchNorm default weight
    beta = jnp.zeros((O2,), jnp.float32)   # BatchNorm default bias

    out = model_forward(x, w1, b1, w2, b2, gamma, beta)
    out = jax.block_until_ready(out)

    ref = _reference(x, w1, b1, w2, b2, gamma, beta)

    assert out.shape == (N, O2, L - 2), out.shape
    assert bool(jnp.allclose(out, ref, atol=1e-4, rtol=1e-4)), float(
        jnp.max(jnp.abs(out - ref))
    )
    print("KERNEL_OK")
</pallas_src>

<mosaic_0001>
module attributes {stable_mosaic.version = 11 : i64} {
  func.func @kernel(%arg0: memref<2x2x16xf32, #tpu.memory_space<vmem>>, %arg1: memref<16xf32, #tpu.memory_space<smem>>, %arg2: memref<2x2x14xf32, #tpu.memory_space<vmem>>) attributes {dimension_semantics = [], scalar_prefetch = 0 : i64, scratch_operands = 0 : i64, tpu.core_type = #tpu.core_type<tc>} {
    %c0 = arith.constant 0 : index
    %c0_0 = arith.constant 0 : index
    %c0_1 = arith.constant 0 : index
    %0 = vector.load %arg0[%c0, %c0_0, %c0_1] : memref<2x2x16xf32, #tpu.memory_space<vmem>>, vector<2x2x16xf32>
    %1 = vector.extract_strided_slice %0 {offsets = [0, 0, 0], sizes = [2, 1, 14], strides = [1, 1, 1]} : vector<2x2x16xf32> to vector<2x1x14xf32>
    %2 = vector.shape_cast %1 : vector<2x1x14xf32> to vector<2x14xf32>
    %3 = vector.extract_strided_slice %0 {offsets = [0, 0, 1], sizes = [2, 1, 14], strides = [1, 1, 1]} : vector<2x2x16xf32> to vector<2x1x14xf32>
    %4 = vector.shape_cast %3 : vector<2x1x14xf32> to vector<2x14xf32>
    %5 = vector.extract_strided_slice %0 {offsets = [0, 0, 2], sizes = [2, 1, 14], strides = [1, 1, 1]} : vector<2x2x16xf32> to vector<2x1x14xf32>
    %6 = vector.shape_cast %5 : vector<2x1x14xf32> to vector<2x14xf32>
    %7 = vector.extract_strided_slice %0 {offsets = [0, 1, 0], sizes = [2, 1, 14], strides = [1, 1, 1]} : vector<2x2x16xf32> to vector<2x1x14xf32>
    %8 = vector.shape_cast %7 : vector<2x1x14xf32> to vector<2x14xf32>
    %9 = vector.extract_strided_slice %0 {offsets = [0, 1, 1], sizes = [2, 1, 14], strides = [1, 1, 1]} : vector<2x2x16xf32> to vector<2x1x14xf32>
    %10 = vector.shape_cast %9 : vector<2x1x14xf32> to vector<2x14xf32>
    %11 = vector.extract_strided_slice %0 {offsets = [0, 1, 2], sizes = [2, 1, 14], strides = [1, 1, 1]} : vector<2x2x16xf32> to vector<2x1x14xf32>
    %12 = vector.shape_cast %11 : vector<2x1x14xf32> to vector<2x14xf32>
    %c0_2 = arith.constant 0 : index
    %13 = memref.load %arg1[%c0_2] : memref<16xf32, #tpu.memory_space<smem>>
    %14 = vector.broadcast %13 : f32 to vector<2x14xf32>
    %15 = arith.mulf %14, %2 : vector<2x14xf32>
    %c1 = arith.constant 1 : index
    %16 = memref.load %arg1[%c1] : memref<16xf32, #tpu.memory_space<smem>>
    %17 = vector.broadcast %16 : f32 to vector<2x14xf32>
    %18 = arith.mulf %17, %4 : vector<2x14xf32>
    %19 = arith.addf %15, %18 : vector<2x14xf32>
    %c2 = arith.constant 2 : index
    %20 = memref.load %arg1[%c2] : memref<16xf32, #tpu.memory_space<smem>>
    %21 = vector.broadcast %20 : f32 to vector<2x14xf32>
    %22 = arith.mulf %21, %6 : vector<2x14xf32>
    %23 = arith.addf %19, %22 : vector<2x14xf32>
    %c3 = arith.constant 3 : index
    %24 = memref.load %arg1[%c3] : memref<16xf32, #tpu.memory_space<smem>>
    %25 = vector.broadcast %24 : f32 to vector<2x14xf32>
    %26 = arith.mulf %25, %8 : vector<2x14xf32>
    %27 = arith.addf %23, %26 : vector<2x14xf32>
    %c4 = arith.constant 4 : index
    %28 = memref.load %arg1[%c4] : memref<16xf32, #tpu.memory_space<smem>>
    %29 = vector.broadcast %28 : f32 to vector<2x14xf32>
    %30 = arith.mulf %29, %10 : vector<2x14xf32>
    %31 = arith.addf %27, %30 : vector<2x14xf32>
    %c5 = arith.constant 5 : index
    %32 = memref.load %arg1[%c5] : memref<16xf32, #tpu.memory_space<smem>>
    %33 = vector.broadcast %32 : f32 to vector<2x14xf32>
    %34 = arith.mulf %33, %12 : vector<2x14xf32>
    %35 = arith.addf %31, %34 : vector<2x14xf32>
    %c6 = arith.constant 6 : index
    %36 = memref.load %arg1[%c6] : memref<16xf32, #tpu.memory_space<smem>>
    %37 = vector.broadcast %36 : f32 to vector<2x14xf32>
    %38 = arith.mulf %37, %2 : vector<2x14xf32>
    %c7 = arith.constant 7 : index
    %39 = memref.load %arg1[%c7] : memref<16xf32, #tpu.memory_space<smem>>
    %40 = vector.broadcast %39 : f32 to vector<2x14xf32>
    %41 = arith.mulf %40, %4 : vector<2x14xf32>
    %42 = arith.addf %38, %41 : vector<2x14xf32>
    %c8 = arith.constant 8 : index
    %43 = memref.load %arg1[%c8] : memref<16xf32, #tpu.memory_space<smem>>
    %44 = vector.broadcast %43 : f32 to vector<2x14xf32>
    %45 = arith.mulf %44, %6 : vector<2x14xf32>
    %46 = arith.addf %42, %45 : vector<2x14xf32>
    %c9 = arith.constant 9 : index
    %47 = memref.load %arg1[%c9] : memref<16xf32, #tpu.memory_space<smem>>
    %48 = vector.broadcast %47 : f32 to vector<2x14xf32>
    %49 = arith.mulf %48, %8 : vector<2x14xf32>
    %50 = arith.addf %46, %49 : vector<2x14xf32>
    %c10 = arith.constant 10 : index
    %51 = memref.load %arg1[%c10] : memref<16xf32, #tpu.memory_space<smem>>
    %52 = vector.broadcast %51 : f32 to vector<2x14xf32>
    %53 = arith.mulf %52, %10 : vector<2x14xf32>
    %54 = arith.addf %50, %53 : vector<2x14xf32>
    %c11 = arith.constant 11 : index
    %55 = memref.load %arg1[%c11] : memref<16xf32, #tpu.memory_space<smem>>
    %56 = vector.broadcast %55 : f32 to vector<2x14xf32>
    %57 = arith.mulf %56, %12 : vector<2x14xf32>
    %58 = arith.addf %54, %57 : vector<2x14xf32>
    %59 = arith.mulf %35, %35 : vector<2x14xf32>
    %60 = arith.mulf %58, %58 : vector<2x14xf32>
    %61 = tpu.concatenate %35, %58, %59, %60 in 0 : vector<2x14xf32>, vector<2x14xf32>, vector<2x14xf32>, vector<2x14xf32> -> vector<8x14xf32>
    %cst = arith.constant dense<0.000000e+00> : vector<8xf32>
    %62 = vector.multi_reduction <add>, %61, %cst [1] : vector<8x14xf32> to vector<8xf32>
    %63 = vector.shape_cast %62 : vector<8xf32> to vector<8x1xf32>
    %64 = vector.extract_strided_slice %63 {offsets = [0, 0], sizes = [2, 1], strides = [1, 1]} : vector<8x1xf32> to vector<2x1xf32>
    %65 = vector.shape_cast %64 : vector<2x1xf32> to vector<1x2x1xf32>
    %cst_3 = arith.constant dense<0.000000e+00> : vector<1xf32>
    %66 = vector.multi_reduction <add>, %65, %cst_3 [1, 2] : vector<1x2x1xf32> to vector<1xf32>
    %67 = vector.shape_cast %66 : vector<1xf32> to vector<1x1x1xf32>
    %68 = vector.extract %67[0, 0, 0] : f32 from vector<1x1x1xf32>
    %69 = vector.extract_strided_slice %63 {offsets = [4, 0], sizes = [2, 1], strides = [1, 1]} : vector<8x1xf32> to vector<2x1xf32>
    %70 = vector.shape_cast %69 : vector<2x1xf32> to vector<1x2x1xf32>
    %cst_4 = arith.constant dense<0.000000e+00> : vector<1xf32>
    %71 = vector.multi_reduction <add>, %70, %cst_4 [1, 2] : vector<1x2x1xf32> to vector<1xf32>
    %72 = vector.shape_cast %71 : vector<1xf32> to vector<1x1x1xf32>
    %73 = vector.extract %72[0, 0, 0] : f32 from vector<1x1x1xf32>
    %cst_5 = arith.constant 0.0357142873 : f32
    %74 = arith.mulf %68, %cst_5 : f32
    %cst_6 = arith.constant 0.0357142873 : f32
    %75 = arith.mulf %73, %cst_6 : f32
    %76 = arith.mulf %74, %74 : f32
    %77 = arith.subf %75, %76 : f32
    %c12 = arith.constant 12 : index
    %78 = memref.load %arg1[%c12] : memref<16xf32, #tpu.memory_space<smem>>
    %c14 = arith.constant 14 : index
    %79 = memref.load %arg1[%c14] : memref<16xf32, #tpu.memory_space<smem>>
    %cst_7 = arith.constant 9.99999974E-6 : f32
    %80 = arith.addf %77, %cst_7 : f32
    %81 = math.rsqrt %80 : f32
    %82 = arith.mulf %78, %81 : f32
    %83 = arith.mulf %74, %82 : f32
    %84 = arith.subf %79, %83 : f32
    %85 = vector.broadcast %82 : f32 to vector<2x14xf32>
    %86 = arith.mulf %35, %85 : vector<2x14xf32>
    %87 = vector.broadcast %84 : f32 to vector<2x14xf32>
    %88 = arith.addf %86, %87 : vector<2x14xf32>
    %c0_8 = arith.constant 0 : index
    %c0_9 = arith.constant 0 : index
    %c0_10 = arith.constant 0 : index
    %89 = vector.load %arg2[%c0_8, %c0_9, %c0_10] : memref<2x2x14xf32, #tpu.memory_space<vmem>>, vector<2x1x14xf32>
    %90 = vector.shape_cast %89 : vector<2x1x14xf32> to vector<2x14xf32>
    %91 = vector.shape_cast %88 : vector<2x14xf32> to vector<2x1x14xf32>
    tpu.vector_store %arg2[%c0_8, %c0_9, %c0_10], %91 {strides = array<i32>} : memref<2x2x14xf32, #tpu.memory_space<vmem>>, vector<2x1x14xf32>,
    %92 = vector.extract_strided_slice %63 {offsets = [2, 0], sizes = [2, 1], strides = [1, 1]} : vector<8x1xf32> to vector<2x1xf32>
    %93 = vector.shape_cast %92 : vector<2x1xf32> to vector<1x2x1xf32>
    %cst_11 = arith.constant dense<0.000000e+00> : vector<1xf32>
    %94 = vector.multi_reduction <add>, %93, %cst_11 [1, 2] : vector<1x2x1xf32> to vector<1xf32>
    %95 = vector.shape_cast %94 : vector<1xf32> to vector<1x1x1xf32>
    %96 = vector.extract %95[0, 0, 0] : f32 from vector<1x1x1xf32>
    %97 = vector.extract_strided_slice %63 {offsets = [6, 0], sizes = [2, 1], strides = [1, 1]} : vector<8x1xf32> to vector<2x1xf32>
    %98 = vector.shape_cast %97 : vector<2x1xf32> to vector<1x2x1xf32>
    %cst_12 = arith.constant dense<0.000000e+00> : vector<1xf32>
    %99 = vector.multi_reduction <add>, %98, %cst_12 [1, 2] : vector<1x2x1xf32> to vector<1xf32>
    %100 = vector.shape_cast %99 : vector<1xf32> to vector<1x1x1xf32>
    %101 = vector.extract %100[0, 0, 0] : f32 from vector<1x1x1xf32>
    %cst_13 = arith.constant 0.0357142873 : f32
    %102 = arith.mulf %96, %cst_13 : f32
    %cst_14 = arith.constant 0.0357142873 : f32
    %103 = arith.mulf %101, %cst_14 : f32
    %104 = arith.mulf %102, %102 : f32
    %105 = arith.subf %103, %104 : f32
    %c13 = arith.constant 13 : index
    %106 = memref.load %arg1[%c13] : memref<16xf32, #tpu.memory_space<smem>>
    %c15 = arith.constant 15 : index
    %107 = memref.load %arg1[%c15] : memref<16xf32, #tpu.memory_space<smem>>
    %cst_15 = arith.constant 9.99999974E-6 : f32
    %108 = arith.addf %105, %cst_15 : f32
    %109 = math.rsqrt %108 : f32
    %110 = arith.mulf %106, %109 : f32
    %111 = arith.mulf %102, %110 : f32
    %112 = arith.subf %107, %111 : f32
    %113 = vector.broadcast %110 : f32 to vector<2x14xf32>
    %114 = arith.mulf %58, %113 : vector<2x14xf32>
    %115 = vector.broadcast %112 : f32 to vector<2x14xf32>
    %116 = arith.addf %114, %115 : vector<2x14xf32>
    %c0_16 = arith.constant 0 : index
    %c1_17 = arith.constant 1 : index
    %c0_18 = arith.constant 0 : index
    %117 = vector.load %arg2[%c0_16, %c1_17, %c0_18] : memref<2x2x14xf32, #tpu.memory_space<vmem>>, vector<2x1x14xf32>
    %118 = vector.shape_cast %117 : vector<2x1x14xf32> to vector<2x14xf32>
    %119 = vector.shape_cast %116 : vector<2x14xf32> to vector<2x1x14xf32>
    tpu.vector_store %arg2[%c0_16, %c1_17, %c0_18], %119 {strides = array<i32>} : memref<2x2x14xf32, #tpu.memory_space<vmem>>, vector<2x1x14xf32>,
    return
  }
}

</mosaic_0001>

<bundles_post_ra>
// kernel: tpu_custom_call.1
= control target key start
LH: loop header
LB: loop body
LE: loop exit
PB: predicated region body
PF: predicated region fallthrough
CT: control target
= control target key end

     0   :  { %7 = vsyncpa [#allocation3], 0  ;;  %s553_s0 = inlined_call_operand.hbm [shape: f32[2,2,16], index: 0, kind: input, shape index: {}]   ;;  %s554_s1 = inlined_call_operand.vmem [shape: f32[16], index: 1, kind: input, shape index: {}]   ;;  %s555_s2 = inlined_call_operand.hbm [shape: f32[2,2,14], index: 2, kind: output, shape index: {}]  }
   0x1   :  { %8 = vsyncpa [#allocation5], 0 }
   0x2   :  { %9 = vsyncpa [#allocation4], 0  ;;  %s439_s9 = smov [#allocation2]   ;;  %s28_s13 = sshll.u32 %s554_s1, 4  ;;  %s29_s13 = int_to_ptr.vmem [resolvable:$true] %s28_s13 }
   0x3   :  { %s15_s10 = sshll.u32 %s439_s9, 4  ;;  %s16_s10 = int_to_ptr.vmem [resolvable:$true] %s15_s10 }
   0x4   :  { %s389_s14 = scalar_lea.vmem %s16_s10, 64  ;;  %p394_p1 = scmp.lt.s32.totalorder %s16_s10, %s16_s10 }
   0x5   :  { %p390_p0 = scmp.ne.s32.totalorder %s16_s10, %s389_s14  ;;  %p395_p2 = scmp.lt.s32.totalorder %s389_s14, %s389_s14 }
   0x7   :  { %p396_p3 = por %p395_p2, %p394_p1 }
   0x9   :  { %p397_p4 = pnand %p396_p3, %p390_p0 }
   0xb   :  { %400 = shalt.err (!%p397_p4)
}
   0xc   :  { %s440_s15 = smov 32   ;;  %s441_s16 = smov 2  }
   0xd   :  { %21 = dma.hbm_to_vmem [thread:$0]  %s553_s0, 64, %s16_s10, [#allocation3], %s440_s15, %s440_s15, %s441_s16  }
   0xe   :  { %s401_s19 = scalar_lea.vmem %s29_s13, 16  ;;  %p406_p6 = scmp.lt.s32.totalorder %s29_s13, %s29_s13 }
   0xf   :  { %p402_p5 = scmp.ne.s32.totalorder %s29_s13, %s401_s19  ;;  %p407_p7 = scmp.lt.s32.totalorder %s401_s19, %s401_s19 }
  0x11   :  { %p408_p8 = por %p407_p7, %p406_p6 }
  0x13   :  { %p409_p9 = pnand %p408_p8, %p402_p5 }
  0x15   :  { %412 = shalt.err (!%p409_p9)
}
  0x16   :  { %s442_s1 = smov [#allocation6]  }
  0x17   :  { %31 = dma.vmem_to_smem %s29_s13, 16, %s442_s1, [#allocation5]  }
  0x18   :  { %433 = dma.done.wait [#allocation3], 64  }
  0x19   :  { %434 = vsyncadd [#allocation3], 4294967232 }
  0x1a   :  { %435 = dma.done.wait [#allocation5], 16  }
  0x1b   :  { %436 = vsyncadd [#allocation5], 4294967280 }
  0x1c   :  { %38 = sfence }
  0x1d   :  { %s349_s20 = sld [smem:[#allocation6 + $0x7]]  ;;  %v470_v0 = vld [vmem:[#allocation2] sm:$0x3]  ;;  %v472_v1 = vld [vmem:[#allocation2 + $0x2] sm:$0x3]  ;;  %s443_s24 = smov 127  }
  0x1e   :  { %s343_s21 = sld [smem:[#allocation6 + $0x1]]  ;;  %s444_s27 = smov 126   ;;  %vm200_vm0 = vcmask 1041409   ;;  %vm207_vm1 = vcmask 1043459   ;;  %vm214_vm2 = vcmask 1045509   ;;  %vm224_vm3 = vcmask 1041408  }
  0x1f   :  { %s344_s22 = sld [smem:[#allocation6 + $0x2]]  ;;  %vm221_vm4 = vcmask 1047559   ;;  %vm226_vm5 = vcmask 1043456   ;;  %vm228_vm6 = vcmask 1045504   ;;  %vm230_vm7 = vcmask 113664  }
  0x20   :  { %s350_s0 = sld [smem:[#allocation6 + $0x8]]  ;;  %vm234_vm8 = vcmask 1024   ;;  %vm277_vm9 = vcmask 106496  }
  0x21   :  { %s346_s23 = sld [smem:[#allocation6 + $0x4]] }
  0x22   :  { %s352_s25 = sld [smem:[#allocation6 + $0xa]] }
  0x23   :  { %v122_v2 = vstv %s349_s20  ;;  %s347_s26 = sld [smem:[#allocation6 + $0x5]] }
  0x24   :  { %v123_v3 = vmul.f32 %v122_v2, %v470_v0  ;;  %v46_v4 = vstv %s343_s21  ;;  %v124_v6 = vmul.f32 %v122_v2, %v472_v1  ;;  %s353_s28 = sld [smem:[#allocation6 + $0xb]] }
  0x25   :  { %v47_v5 = vmul.f32 %v46_v4, %v470_v0  ;;  %v48_v7 = vmul.f32 %v46_v4, %v472_v1  ;;  %v60_v8 = vstv %s344_s22  ;;  %s41_s29 = sld [smem:[#allocation6]] }
  0x26   :  { %127 = vrot.lane.b32.xlu1 %v123_v3, %s443_s24  ;;  %v62_v9 = vmul.f32 %v60_v8, %v472_v1  ;;  %v61_v10 = vmul.f32 %v60_v8, %v470_v0  ;;  %v136_v11 = vstv %s350_s0  ;;  %s345_s30 = sld [smem:[#allocation6 + $0x3]] }
  0x27   :  { %51 = vrot.lane.b32.xlu0 %v47_v5, %s443_s24  ;;  %v86_v12 = vstv %s346_s23  ;;  %v138_v13 = vmul.f32 %v136_v11, %v472_v1  ;;  %v137_v15 = vmul.f32 %v136_v11, %v470_v0  ;;  %s348_s3 = sld [smem:[#allocation6 + $0x6]] }
  0x28   :  { %v88_v14 = vmul.f32 %v86_v12, %v472_v1  ;;  %v87_v16 = vmul.f32 %v86_v12, %v470_v0  ;;  %v162_v17 = vstv %s352_s25  ;;  %s351_s4 = sld [smem:[#allocation6 + $0x9]] }
  0x29   :  { %v164_v19 = vmul.f32 %v162_v17, %v472_v1  ;;  %v163_v21 = vmul.f32 %v162_v17, %v470_v0  ;;  %v102_v22 = vstv %s347_s26  ;;  %s354_s12 = sld [smem:[#allocation6 + $0xc]] }
  0x2a   :  { %129 = vrot.lane.b32.xlu1 %v124_v6, %s443_s24  ;;  %v92_v18 = vrot.slane %v88_v14, 1  ;;  %v91_v20 = vrot.slane %v87_v16, 1  ;;  %v104_v24 = vmul.f32 %v102_v22, %v472_v1  ;;  %v103_v26 = vmul.f32 %v102_v22, %v470_v0  ;;  %s355_s13 = sld [smem:[#allocation6 + $0xe]] }
  0x2b   :  { %53 = vrot.lane.b32.xlu0 %v48_v7, %s443_s24  ;;  %v168_v23 = vrot.slane %v164_v19, 1  ;;  %v167_v25 = vrot.slane %v163_v21, 1  ;;  %v178_v27 = vstv %s353_s28  ;;  %v42_v39 = vstv %s41_s29  ;;  %s356_s25 = sld [smem:[#allocation6 + $0xd]] }
  0x2c   :  { %v108_v28 = vrot.slane %v104_v24, 1  ;;  %v180_v29 = vmul.f32 %v178_v27, %v472_v1  ;;  %v107_v30 = vrot.slane %v103_v26, 1  ;;  %v179_v31 = vmul.f32 %v178_v27, %v470_v0  ;;  %s357_s26 = sld [smem:[#allocation6 + $0xf]] }
  0x2d   :  { %v74_v41 = vstv %s345_s30  ;;  %v44_v42 = vmul.f32 %v42_v39, %v472_v1  ;;  %v43_v43 = vmul.f32 %v42_v39, %v470_v0  ;;  %v118_v45 = vstv %s348_s3  ;;  %s445_s3 = smov [#allocation7]  }
  0x2e   :  { %67 = vrot.lane.b32.xlu1 %v62_v9, %s444_s27  ;;  %v184_v32 = vrot.slane %v180_v29, 1  ;;  %v183_v33 = vrot.slane %v179_v31, 1  ;;  %v76_v47 = vmul.f32 %v74_v41, %v472_v1  ;;  %v75_v48 = vmul.f32 %v74_v41, %v470_v0 }
  0x2f   :  { %65 = vrot.lane.b32.xlu0 %v61_v10, %s444_s27  ;;  %v150_v49 = vstv %s351_s4  ;;  %v120_v50 = vmul.f32 %v118_v45, %v472_v1  ;;  %v119_v52 = vmul.f32 %v118_v45, %v470_v0  ;;  %s330_s4 = sshll.u32 %s445_s3, 4  ;;  %s331_s4 = int_to_ptr.vmem [resolvable:$true] %s330_s4 }
  0x30   :  { %v80_v56 = vrot.slane %v76_v47, 1  ;;  %v152_v58 = vmul.f32 %v150_v49, %v472_v1  ;;  %v79_v60 = vrot.slane %v75_v48, 1  ;;  %v151_v61 = vmul.f32 %v150_v49, %v470_v0  ;;  %p418_p11 = scmp.lt.s32.totalorder %s331_s4, %s331_s4 }
  0x32   :  { %143 = vrot.lane.b32.xlu1 %v138_v13, %s444_s27  ;;  %v156_v5 = vrot.slane %v152_v58, 1  ;;  %v155_v9 = vrot.slane %v151_v61, 1 }
  0x33   :  { %141 = vrot.lane.b32.xlu0 %v137_v15, %s444_s27 }
  0x36   :  { %95 = vrot.lane.b32.xlu1 %v92_v18, %s443_s24 }
  0x37   :  { %93 = vrot.lane.b32.xlu0 %v91_v20, %s443_s24 }
  0x3a   :  { %171 = vrot.lane.b32.xlu1 %v168_v23, %s443_s24 }
  0x3b   :  { %169 = vrot.lane.b32.xlu0 %v167_v25, %s443_s24 }
  0x3e   :  { %111 = vrot.lane.b32.xlu1 %v108_v28, %s444_s27 }
  0x3f   :  { %109 = vrot.lane.b32.xlu0 %v107_v30, %s444_s27 }
  0x42   :  { %187 = vrot.lane.b32.xlu1 %v184_v32, %s444_s27 }
  0x43   :  { %185 = vrot.lane.b32.xlu0 %v183_v33, %s444_s27 }
  0x98   :  { %v128_v34 = vpop.permute.xlu1 %127 }
  0x99   :  { %v52_v35 = vpop.permute.xlu0 %51  ;;  %v133_v63 = vadd.f32 %v128_v34, %v119_v52 }
  0x9a   :  { %v57_v53 = vadd.f32 %v52_v35, %v43_v43 }
  0x9c   :  { %v130_v36 = vpop.permute.xlu1 %129 }
  0x9d   :  { %v54_v37 = vpop.permute.xlu0 %53  ;;  %v134_v62 = vadd.f32 %v130_v36, %v120_v50 }
  0x9e   :  { %v58_v51 = vadd.f32 %v54_v37, %v44_v42 }
  0xa0   :  { %v68_v38 = vpop.permute.xlu1 %67 }
  0xa1   :  { %v66_v40 = vpop.permute.xlu0 %65  ;;  %v72_v55 = vadd.f32 %v68_v38, %v58_v51 }
  0xa2   :  { %v71_v59 = vadd.f32 %v66_v40, %v57_v53 }
  0xa3   :  { %v84_v4 = vadd.f32 %v80_v56, %v72_v55 }
  0xa4   :  { %v144_v44 = vpop.permute.xlu1 %143  ;;  %v83_v8 = vadd.f32 %v79_v60, %v71_v59 }
  0xa5   :  { %v142_v46 = vpop.permute.xlu0 %141  ;;  %v148_v3 = vadd.f32 %v144_v44, %v134_v62 }
  0xa6   :  { %v147_v7 = vadd.f32 %v142_v46, %v133_v63 }
  0xa7   :  { %v160_v13 = vadd.f32 %v156_v5, %v148_v3 }
  0xa8   :  { %v96_v54 = vpop.permute.xlu1 %95  ;;  %v159_v15 = vadd.f32 %v155_v9, %v147_v7 }
  0xa9   :  { %v94_v57 = vpop.permute.xlu0 %93  ;;  %v100_v10 = vadd.f32 %v96_v54, %v84_v4 }
  0xaa   :  { %v99_v11 = vadd.f32 %v94_v57, %v83_v8 }
  0xac   :  { %v172_v2 = vpop.permute.xlu1 %171 }
  0xad   :  { %v170_v6 = vpop.permute.xlu0 %169  ;;  %v176_v0 = vadd.f32 %v172_v2, %v160_v13 }
  0xae   :  { %v175_v18 = vadd.f32 %v170_v6, %v159_v15 }
  0xb0   :  { %v112_v12 = vpop.permute.xlu1 %111 }
  0xb1   :  { %v514_v14 = vadd.f32 %v112_v12, %v100_v10  ;;  %v110_v1 = vpop.permute.xlu0 %109 }
  0xb2   :  { %v516_v16 = vadd.f32 %v110_v1, %v99_v11 }
  0xb3   :  { %v194_v17 = vmul.f32 %v514_v14, %v514_v14  ;;  %v199_v23 = vrot.slane %v514_v14, 7 }
  0xb4   :  { %v193_v19 = vmul.f32 %v516_v16, %v516_v16  ;;  %v188_v20 = vpop.permute.xlu1 %187 }
  0xb5   :  { %v522_v21 = vadd.f32 %v188_v20, %v176_v0  ;;  %v186_v22 = vpop.permute.xlu0 %185  ;;  %v213_v25 = vrot.slane %v194_v17, 3  ;;  %v201_v32 = vsel %vm200_vm0, %v199_v23, %v516_v16 }
  0xb6   :  { %v525_v24 = vadd.f32 %v186_v22, %v175_v18  ;;  %v212_v26 = vrot.slane %v193_v19, 4 }
  0xb7   :  { %v196_v27 = vmul.f32 %v522_v21, %v522_v21  ;;  %v206_v28 = vrot.slane %v522_v21, 5 }
  0xb8   :  { %v195_v29 = vmul.f32 %v525_v24, %v525_v24  ;;  %v205_v30 = vrot.slane %v525_v24, 6  ;;  %v215_v35 = vsel %vm214_vm2, %v213_v25, %v212_v26 }
  0xb9   :  { %v220_v31 = vrot.slane %v196_v27, 1 }
  0xba   :  { %v219_v33 = vrot.slane %v195_v29, 2  ;;  %v208_v34 = vsel %vm207_vm1, %v206_v28, %v205_v30 }
  0xbb   :  { %v225_v36 = vsel %vm224_vm3, %v201_v32, %v208_v34 }
  0xbc   :  { %v222_v37 = vsel %vm221_vm4, %v220_v31, %v219_v33  ;;  %v227_v38 = vsel %vm226_vm5, %v225_v36, %v215_v35 }
  0xbd   :  { %v229_v39 = vsel %vm228_vm6, %v227_v38, %v222_v37 }
  0xbe   :  { %v231_v40 = vsel %vm230_vm7, %v229_v39, 0.0 }
  0xbf   :  { %232 = vadd.xlane.f32.xlu0 %v231_v40 }
 0x148   :  { %v233_v41 = vpop.xlane.xlu0 %232 }
 0x149   :  { %v235_v42 = vsel %vm234_vm8, %v233_v41, 0.0  ;;  %v246_v43 = vrot.slane %v233_v41, 4  ;;  %v292_v44 = vrot.slane %v233_v41, 6  ;;  %v280_v46 = vrot.slane %v233_v41, 2 }
 0x14a   :  { %236 = vadd.xlane.f32.xlu1 %v235_v42 }
 0x14b   :  { %v248_v45 = vsel %vm234_vm8, %v246_v43, 0.0  ;;  %v294_v47 = vsel %vm234_vm8, %v292_v44, 0.0  ;;  %v282_v48 = vsel %vm234_vm8, %v280_v46, 0.0 }
 0x14c   :  { %249 = vadd.xlane.f32.xlu0 %v248_v45 }
 0x14e   :  { %295 = vadd.xlane.f32.xlu1 %v294_v47 }
 0x150   :  { %283 = vadd.xlane.f32.xlu0 %v282_v48 }
 0x1d3   :  { %v237_v49 = vpop.xlane.xlu1 %236 }
 0x1d4   :  { %v238_v50 = vrot.slane %v237_v49, 4 }
 0x1d5   :  { %v250_v51 = vpop.xlane.xlu0 %249 }
 0x1d6   :  { %v239_v52 = vadd.f32 %v238_v50, %v237_v49  ;;  %v251_v53 = vrot.slane %v250_v51, 4 }
 0x1d7   :  { %v296_v2 = vpop.xlane.xlu1 %295 }
 0x1d8   :  { %v240_v54 = vrot.slane %v239_v52, 2  ;;  %v252_v55 = vadd.f32 %v251_v53, %v250_v51  ;;  %v297_v4 = vrot.slane %v296_v2, 4 }
 0x1d9   :  { %v284_v63 = vpop.xlane.xlu0 %283 }
 0x1da   :  { %v253_v56 = vrot.slane %v252_v55, 2  ;;  %v241_v57 = vadd.f32 %v240_v54, %v239_v52  ;;  %v285_v3 = vrot.slane %v284_v63, 4  ;;  %v298_v6 = vadd.f32 %v297_v4, %v296_v2 }
 0x1dc   :  { %v242_v58 = vrot.slane %v241_v57, 1  ;;  %v254_v59 = vadd.f32 %v253_v56, %v252_v55  ;;  %v286_v5 = vadd.f32 %v285_v3, %v284_v63  ;;  %v299_v9 = vrot.slane %v298_v6, 2 }
 0x1de   :  { %v243_v60 = vadd.f32 %v242_v58, %v241_v57  ;;  %v255_v61 = vrot.slane %v254_v59, 1  ;;  %v287_v8 = vrot.slane %v286_v5, 2  ;;  %v300_v11 = vadd.f32 %v299_v9, %v298_v6 }
 0x1e0   :  { %358 = vpush %v243_v60  ;;  %v256_v62 = vadd.f32 %v255_v61, %v254_v59  ;;  %v288_v10 = vadd.f32 %v287_v8, %v286_v5  ;;  %v301_v13 = vrot.slane %v300_v11, 1 }
 0x1e2   :  { %360 = vpush %v256_v62  ;;  %v289_v12 = vrot.slane %v288_v10, 1  ;;  %v302_v0 = vadd.f32 %v301_v13, %v300_v11 }
 0x1e4   :  { %v290_v15 = vadd.f32 %v289_v12, %v288_v10 }
 0x211   :  { %s359_s5 = spop %358 }
 0x212   :  { %s534_s6 = smul.f32 0.035714287, %s359_s5  ;;  %s413_s5 = scalar_lea.vmem %s331_s4, 64 }
 0x213   :  { %s361_s7 = spop %360  ;;  %p414_p10 = scmp.ne.s32.totalorder %s331_s4, %s413_s5 }
 0x214   :  { %s260_s8 = smul.f32 %s534_s6, %s534_s6  ;;  %p419_p12 = scmp.lt.s32.totalorder %s413_s5, %s413_s5 }
 0x215   :  { %s259_s9 = smul.f32 0.035714287, %s361_s7 }
 0x216   :  { %p420_p13 = por %p419_p12, %p418_p11 }
 0x217   :  { %s261_s10 = ssub.f32 %s259_s9, %s260_s8 }
 0x218   :  { %p421_p0 = pnand %p420_p13, %p414_p10 }
 0x219   :  { %s264_s11 = sadd.f32 1e-05, %s261_s10 }
 0x21b   :  { %v265_v7 = vstv %s264_s11 }
 0x21c   :  { %377 = vrsqrt.f32 %v265_v7 }
 0x229   :  { %v378_v1 = vpop.eup %377 }
 0x22a   :  { %362 = vpush %v378_v1 }
 0x22b   :  { %364 = vpush %v290_v15 }
 0x22c   :  { %366 = vpush %v302_v0 }
 0x25b   :  { %s363_s14 = spop %362 }
 0x25c   :  { %s268_s17 = smul.f32 %s363_s14, %s354_s12  ;;  %s365_s18 = spop %364 }
 0x25d   :  { %s304_s19 = smul.f32 0.035714287, %s365_s18  ;;  %s367_s1 = spop %366 }
 0x25e   :  { %s269_s20 = smul.f32 %s268_s17, %s534_s6  ;;  %v271_v17 = vstv %s268_s17 }
 0x25f   :  { %s306_s21 = smul.f32 %s304_s19, %s304_s19  ;;  %v272_v18 = vmul.f32 %v271_v17, %v516_v16  ;;  %v273_v19 = vmul.f32 %v271_v17, %v514_v14 }
 0x260   :  { %s270_s22 = ssub.f32 %s355_s13, %s269_s20  ;;  %s305_s0 = smul.f32 0.035714287, %s367_s1 }
 0x262   :  { %v274_v20 = vstv %s270_s22  ;;  %s307_s23 = ssub.f32 %s305_s0, %s306_s21 }
 0x263   :  { %v275_v22 = vadd.f32 %v274_v20, %v272_v18  ;;  %v276_v23 = vadd.f32 %v274_v20, %v273_v19 }
 0x264   :  { %s310_s24 = sadd.f32 1e-05, %s307_s23 }
 0x265   :  { %278 = vst.msk [vmem:[#allocation7] sm:$0x1] %vm277_vm9, %v275_v22  ;;  %279 = vst.msk [vmem:[#allocation7 + $0x2] sm:$0x1] %vm277_vm9, %v276_v23 }
 0x266   :  { %v311_v25 = vstv %s310_s24 }
 0x267   :  { %379 = vrsqrt.f32 %v311_v25 }
 0x274   :  { %v380_v26 = vpop.eup %379 }
 0x275   :  { %368 = vpush %v380_v26 }
 0x2a6   :  { %s369_s27 = spop %368 }
 0x2a7   :  { %s314_s28 = smul.f32 %s369_s27, %s356_s25 }
 0x2a9   :  { %s315_s29 = smul.f32 %s314_s28, %s304_s19  ;;  %v317_v14 = vstv %s314_s28 }
 0x2aa   :  { %v318_v16 = vmul.f32 %v317_v14, %v525_v24  ;;  %v319_v27 = vmul.f32 %v317_v14, %v522_v21 }
 0x2ab   :  { %s316_s30 = ssub.f32 %s357_s26, %s315_s29 }
 0x2ad   :  { %v320_v28 = vstv %s316_s30 }
 0x2ae   :  { %v321_v29 = vadd.f32 %v320_v28, %v318_v16  ;;  %v322_v30 = vadd.f32 %v320_v28, %v319_v27 }
 0x2b0   :  { %323 = vst.msk [vmem:[#allocation7 + $0x1] sm:$0x1] %vm277_vm9, %v321_v29  ;;  %324 = vst.msk [vmem:[#allocation7 + $0x3] sm:$0x1] %vm277_vm9, %v322_v30 }
 0x2b1   :  { %424 = shalt.err (!%p421_p0)
}
 0x2b2   :  { %336 = dma.vmem_to_hbm [thread:$0]  %s331_s4, 64, %s555_s2, [#allocation4], %s440_s15, %s440_s15, %s441_s16  }
 0x2b3   :  { %437 = dma.done.wait [#allocation4], 64  }
 0x2b4   :  { %438 = vsyncadd [#allocation4], 4294967232 }
 0x2b5   :  { %340 = vsyncpa [#allocation3], 1 }
 0x2b6   :  { %341 = vsyncpa [#allocation4], 1 }
 0x2b7   :  { %342 = vsyncpa [#allocation5], 1 }

</bundles_post_ra>
